<compile_context>
chip_gen: v7x
topology: tpu7x:2x2x1
jax: 0.10.0
libtpu: 0.0.40
codegen_flags: <defaults>
</compile_context>

<pallas_src>
import functools

import jax
import jax.numpy as jnp
from jax import lax
from jax.experimental import pallas as pl
from jax.experimental.pallas import tpu as pltpu


# --------------------------------------------------------------------------- #
# Kernel
# --------------------------------------------------------------------------- #
def _euclid_sim_kernel(x1_ref, x1sq_ref, x2_ref, x2sq_ref, o_ref, *,
                       eps: float, approx: bool):
    # x1_ref  : (1, TN, D)   x1sq_ref: (1, TN, 1)  (precomputed ||x1||^2, f32)
    # x2_ref  : (1, TM, D)   x2sq_ref: (1, 1, TM)  (precomputed ||x2||^2, f32)
    # o_ref   : (1, TN, TM)
    a = x1_ref[0]                       # (TN, D), native dtype -> MXU
    b = x2_ref[0]                       # (TM, D), native dtype -> MXU
    a_sq = x1sq_ref[0]                  # (TN, 1), f32
    b_sq = x2sq_ref[0]                  # (1, TM), f32, lane-dense

    d = a.shape[-1]
    tm = b.shape[0]

    # Contract the feature (lane) dim of both operands; standard TPU "NT"
    # matmul pattern (same as flash-attention q @ k^T), f32 accumulation.
    dn = (((1,), (1,)), ((), ()))
    if d <= tm:
        # Fold the factor 2 into the smaller (TN, D) operand.
        gram2 = lax.dot_general(a * 2, b, dimension_numbers=dn,
                                preferred_element_type=jnp.float32)   # (TN, TM)
    else:
        g = lax.dot_general(a, b, dimension_numbers=dn,
                            preferred_element_type=jnp.float32)
        gram2 = g + g

    sq_dist = jnp.maximum(a_sq + b_sq - gram2, 0.0)
    dist = jnp.sqrt(sq_dist)                                          # cdist p=2

    # (1.0 + eps) is a trace-time scalar -> one fewer (TN, TM) VPU add.
    sim = pl.reciprocal(dist + (1.0 + eps), approx=approx)            # EUP slot
    o_ref[0] = sim.astype(o_ref.dtype)


# --------------------------------------------------------------------------- #
# Tiling / VMEM budgeting
# --------------------------------------------------------------------------- #
def _round_up(x: int, m: int) -> int:
    return ((x + m - 1) // m) * m


def _vmem_capacity_bytes() -> int:
    try:
        cap = getattr(pltpu.get_tpu_info(), "vmem_capacity_bytes", None)
        if cap:
            return int(cap)
    except Exception:
        pass
    return 64 * 1024 * 1024   # conservative default (v7x-sized VMEM)


def _pick_tile(dim: int, candidates) -> int:
    # Largest candidate that divides round_up(dim, 128) -> padding stays < 128.
    dim128 = _round_up(max(dim, 1), 128)
    return max(c for c in candidates if c <= dim128 and dim128 % c == 0)


def _footprint_bytes(tn, tm, d, in_item, out_item):
    # Double-buffered pipeline copies of every operand / output block ...
    io = 2 * ((tn + tm) * d * in_item        # x1, x2 blocks
              + (tn + tm) * 4                # norm blocks (f32)
              + tn * tm * out_item)          # output block
    # ... plus the in-kernel f32 intermediates (gram2, sq_dist, dist).
    intermediates = 3 * tn * tm * 4
    return io + intermediates


def _choose_tiles(N, M, D, in_item, out_item, budget):
    tn = _pick_tile(N, (512, 256, 128))
    tm = _pick_tile(M, (1024, 512, 256, 128))
    # Shrink TN first so the output store width (TM, lane axis) stays wide.
    while _footprint_bytes(tn, tm, D, in_item, out_item) > budget:
        if tn > 128:
            tn //= 2
        elif tm > 128:
            tm //= 2
        else:
            break
    # TODO(synk): for very large D (>~16k) add a K grid axis with an f32 VMEM
    # accumulator instead of relying on 128x128 tiles to fit (TN+TM)*D blocks.
    return tn, tm


# --------------------------------------------------------------------------- #
# Wrapper
# --------------------------------------------------------------------------- #
def euclidean_similarity_matrix(x1: jax.Array, x2: jax.Array, eps: float = 1.0,
                                *, approx_reciprocal: bool = True) -> jax.Array:
    """x1: (B, N, D), x2: (B, M, D) -> (B, N, M) = 1 / (1 + cdist + eps)."""
    B, N, D = x1.shape
    B2, M, D2 = x2.shape
    assert B == B2 and D == D2, "batch / feature dims must match"

    out_dtype = jnp.promote_types(x1.dtype, x2.dtype)
    in_item = jnp.dtype(x1.dtype).itemsize
    out_item = jnp.dtype(out_dtype).itemsize

    # Per-generation VMEM budget (128 MiB v5e/v6e, 64 MiB v7x) with headroom
    # for Mosaic internal scratch; expose the limit to the compiler.
    cap = _vmem_capacity_bytes()
    budget = int(cap * 0.55)
    tn, tm = _choose_tiles(N, M, D, in_item, out_item, budget)
    footprint = _footprint_bytes(tn, tm, D, in_item, out_item)
    vmem_limit = int(min(cap, max(cap * 0.75, footprint + (8 << 20))))

    # Pad N / M to tile multiples -> unmasked lane-dense stores; sliced off
    # after the call. Padded rows are zeros (harmless: sq_dist stays >= 0).
    n_pad = _round_up(N, tn)
    m_pad = _round_up(M, tm)
    if n_pad != N:
        x1 = jnp.pad(x1, ((0, 0), (0, n_pad - N), (0, 0)))
    if m_pad != M:
        x2 = jnp.pad(x2, ((0, 0), (0, m_pad - M), (0, 0)))

    # Precompute squared norms once (f32): (B, N_pad, 1) and (B, 1, M_pad).
    x1_sq = jnp.sum(jnp.square(x1.astype(jnp.float32)), axis=-1, keepdims=True)
    x2_sq = jnp.sum(jnp.square(x2.astype(jnp.float32)), axis=-1)[:, None, :]

    kernel = functools.partial(_euclid_sim_kernel, eps=float(eps),
                               approx=approx_reciprocal)
    out = pl.pallas_call(
        kernel,
        out_shape=jax.ShapeDtypeStruct((B, n_pad, m_pad), out_dtype),
        grid=(B, n_pad // tn, m_pad // tm),
        in_specs=[
            pl.BlockSpec((1, tn, D), lambda b, i, j: (b, i, 0)),   # x1
            pl.BlockSpec((1, tn, 1), lambda b, i, j: (b, i, 0)),   # ||x1||^2
            pl.BlockSpec((1, tm, D), lambda b, i, j: (b, j, 0)),   # x2
            pl.BlockSpec((1, 1, tm), lambda b, i, j: (b, 0, j)),   # ||x2||^2
        ],
        out_specs=pl.BlockSpec((1, tn, tm), lambda b, i, j: (b, i, j)),
        compiler_params=pltpu.CompilerParams(
            # Inner M-axis "arbitrary": megacore split lands on B / N, so the
            # resident x1 / x1_sq blocks are reused across the whole j sweep.
            dimension_semantics=("parallel", "parallel", "arbitrary"),
            vmem_limit_bytes=vmem_limit,
        ),
    )(x1, x1_sq, x2, x2_sq)

    if n_pad != N or m_pad != M:
        out = out[:, :N, :M]
    return out


class EuclideanSimilarityMatrix:
    """JAX/Pallas port of the PyTorch module (dim is unused in the torch forward)."""
    name = "euclidean_matrix"

    def __init__(self, dim: int = 1, eps: float = 1.0) -> None:
        self.dim = dim
        self.eps = eps

    def __call__(self, x1: jax.Array, x2: jax.Array) -> jax.Array:
        return euclidean_similarity_matrix(x1, x2, self.eps)


if __name__ == "__main__":
    key = jax.random.PRNGKey(0)
    k1, k2 = jax.random.split(key)

    B, N, M, D = 2, 64, 64, 32
    x1 = jax.random.normal(k1, (B, N, D), dtype=jnp.float32)
    x2 = jax.random.normal(k2, (B, M, D), dtype=jnp.float32)

    mod = EuclideanSimilarityMatrix(dim=1, eps=1.0)
    out = jax.block_until_ready(mod(x1, x2))

    # Pure-JAX reference (torch.cdist semantics). Tolerance covers the
    # approx (EUP) reciprocal (~1e-3 relative); set approx_reciprocal=False
    # in the wrapper for exact parity.
    diff = x1[:, :, None, :] - x2[:, None, :, :]
    dist_ref = jnp.sqrt(jnp.sum(diff * diff, axis=-1))
    ref = 1.0 / (1.0 + dist_ref + 1.0)
    assert out.shape == (B, N, M)
    assert jnp.max(jnp.abs(out - ref)) < 5e-3

    print("KERNEL_OK")
</pallas_src>

<mosaic_0001>
module attributes {stable_mosaic.version = 11 : i64} {
  func.func @_euclid_sim_kernel(%arg0: i32, %arg1: i32, %arg2: i32, %arg3: memref<1x128x32xf32, #tpu.memory_space<vmem>>, %arg4: memref<1x128x1xf32, #tpu.memory_space<vmem>>, %arg5: memref<1x128x32xf32, #tpu.memory_space<vmem>>, %arg6: memref<1x1x128xf32, #tpu.memory_space<vmem>>, %arg7: memref<1x128x128xf32, #tpu.memory_space<vmem>>) attributes {dimension_semantics = [#tpu.dimension_semantics<parallel>, #tpu.dimension_semantics<parallel>, #tpu.dimension_semantics<arbitrary>], iteration_bounds = array<i64: 2, 1, 1>, scalar_prefetch = 0 : i64, scratch_operands = 0 : i64, tpu.core_type = #tpu.core_type<tc>, window_params = [{transform_indices = @transform_0, window_bounds = array<i64: 1, 128, 32>}, {transform_indices = @transform_1, window_bounds = array<i64: 1, 128, 1>}, {transform_indices = @transform_2, window_bounds = array<i64: 1, 128, 32>}, {transform_indices = @transform_3, window_bounds = array<i64: 1, 1, 128>}, {transform_indices = @transform_4, window_bounds = array<i64: 1, 128, 128>}]} {
    %c0 = arith.constant 0 : index
    %c0_0 = arith.constant 0 : index
    %c0_1 = arith.constant 0 : index
    %0 = vector.load %arg3[%c0, %c0_0, %c0_1] : memref<1x128x32xf32, #tpu.memory_space<vmem>>, vector<1x128x32xf32>
    %1 = vector.shape_cast %0 : vector<1x128x32xf32> to vector<128x32xf32>
    %c0_2 = arith.constant 0 : index
    %c0_3 = arith.constant 0 : index
    %c0_4 = arith.constant 0 : index
    %2 = vector.load %arg5[%c0_2, %c0_3, %c0_4] : memref<1x128x32xf32, #tpu.memory_space<vmem>>, vector<1x128x32xf32>
    %3 = vector.shape_cast %2 : vector<1x128x32xf32> to vector<128x32xf32>
    %c0_5 = arith.constant 0 : index
    %c0_6 = arith.constant 0 : index
    %c0_7 = arith.constant 0 : index
    %4 = vector.load %arg4[%c0_5, %c0_6, %c0_7] : memref<1x128x1xf32, #tpu.memory_space<vmem>>, vector<1x128x1xf32>
    %5 = vector.shape_cast %4 : vector<1x128x1xf32> to vector<128x1xf32>
    %c0_8 = arith.constant 0 : index
    %c0_9 = arith.constant 0 : index
    %c0_10 = arith.constant 0 : index
    %6 = vector.load %arg6[%c0_8, %c0_9, %c0_10] : memref<1x1x128xf32, #tpu.memory_space<vmem>>, vector<1x1x128xf32>
    %7 = vector.shape_cast %6 : vector<1x1x128xf32> to vector<1x128xf32>
    %cst = arith.constant 2.000000e+00 : f32
    %8 = vector.broadcast %cst : f32 to vector<128x32xf32>
    %9 = arith.mulf %1, %8 : vector<128x32xf32>
    %cst_11 = arith.constant dense<0.000000e+00> : vector<128x128xf32>
    %10 = tpu.matmul %9, %3, %cst_11 {dimension_numbers = #tpu.dot_dimension_numbers<[1], [1], [0], [0], [0, 0, 1, 0], [], []>} : vector<128x32xf32>, vector<128x32xf32>, vector<128x128xf32> -> vector<128x128xf32>
    %11 = vector.broadcast %5 : vector<128x1xf32> to vector<128x128xf32>
    %12 = vector.broadcast %7 : vector<1x128xf32> to vector<128x128xf32>
    %13 = arith.addf %11, %12 : vector<128x128xf32>
    %14 = arith.subf %13, %10 : vector<128x128xf32>
    %cst_12 = arith.constant 0.000000e+00 : f32
    %15 = vector.broadcast %cst_12 : f32 to vector<128x128xf32>
    %16 = arith.maximumf %14, %15 : vector<128x128xf32>
    %17 = math.sqrt %16 : vector<128x128xf32>
    %cst_13 = arith.constant 2.000000e+00 : f32
    %18 = vector.broadcast %cst_13 : f32 to vector<128x128xf32>
    %19 = arith.addf %17, %18 : vector<128x128xf32>
    %20 = tpu.reciprocal %19 {approx = true} : vector<128x128xf32> -> vector<128x128xf32>
    %c0_14 = arith.constant 0 : index
    %c0_15 = arith.constant 0 : index
    %c0_16 = arith.constant 0 : index
    %21 = vector.load %arg7[%c0_14, %c0_15, %c0_16] : memref<1x128x128xf32, #tpu.memory_space<vmem>>, vector<1x128x128xf32>
    %22 = vector.shape_cast %21 : vector<1x128x128xf32> to vector<128x128xf32>
    %23 = vector.shape_cast %20 : vector<128x128xf32> to vector<1x128x128xf32>
    tpu.vector_store %arg7[%c0_14, %c0_15, %c0_16], %23 {strides = array<i32>} : memref<1x128x128xf32, #tpu.memory_space<vmem>>, vector<1x128x128xf32>,
    return
  }
  func.func @transform_0(%arg0: i32, %arg1: i32, %arg2: i32) -> (i32, i32, i32) {
    %c0_i32 = arith.constant 0 : i32
    %c0_i32_0 = arith.constant 0 : i32
    return %arg0, %arg1, %c0_i32 : i32, i32, i32
  }
  func.func @transform_1(%arg0: i32, %arg1: i32, %arg2: i32) -> (i32, i32, i32) {
    %c0_i32 = arith.constant 0 : i32
    %c0_i32_0 = arith.constant 0 : i32
    return %arg0, %arg1, %c0_i32 : i32, i32, i32
  }
  func.func @transform_2(%arg0: i32, %arg1: i32, %arg2: i32) -> (i32, i32, i32) {
    %c0_i32 = arith.constant 0 : i32
    %c0_i32_0 = arith.constant 0 : i32
    return %arg0, %arg2, %c0_i32 : i32, i32, i32
  }
  func.func @transform_3(%arg0: i32, %arg1: i32, %arg2: i32) -> (i32, i32, i32) {
    %c0_i32 = arith.constant 0 : i32
    %c0_i32_0 = arith.constant 0 : i32
    return %arg0, %c0_i32, %arg2 : i32, i32, i32
  }
  func.func @transform_4(%arg0: i32, %arg1: i32, %arg2: i32) -> (i32, i32, i32) {
    %c0_i32 = arith.constant 0 : i32
    return %arg0, %arg1, %arg2 : i32, i32, i32
  }
}

</mosaic_0001>

<bundles_post_ra>
// kernel: tpu_custom_call.1
= control target key start
LH: loop header
LB: loop body
LE: loop exit
PB: predicated region body
PF: predicated region fallthrough
CT: control target
= control target key end

     0   :  { %9 = vsyncpa [#allocation3], 0  ;;  %s2000_s0 = inlined_call_operand.vmem [shape: f32[2,128,32], index: 0, kind: input, shape index: {}]   ;;  %s2001_s1 = inlined_call_operand.vmem [shape: f32[2,128,1], index: 1, kind: input, shape index: {}]   ;;  %s2002_s2 = inlined_call_operand.vmem [shape: f32[2,128,32], index: 2, kind: input, shape index: {}]   ;;  %s2003_s3 = inlined_call_operand.vmem [shape: f32[2,1,128], index: 3, kind: input, shape index: {}]   ;;  %s2004_s4 = inlined_call_operand.hbm [shape: f32[2,128,128], index: 4, kind: output, shape index: {}]  }
   0x1   :  { %11 = vsyncpa [#allocation3 + $0x1], 0  ;;  %s1521_s15 = smov 0   ;;  %s1523_s16 = smov 0  }
   0x2   :  { %s1525_s17 = smov 0   ;;  %s1527_s18 = smov 0  }
   0x3   :  { %s1529_s19 = smov 0   ;;  %s1531_s20 = smov 0  }
   0x4 LB: > { %s1082_s21 = sadd.s32 4294967295, %s1490_s20   ;;  %s1083_s22 = sadd.s32 4294967294, %s1490_s20   ;;  %s1490_s20 = sphi %s1531_s20, %s17_s20   ;;  %s1486_s19 = sphi %s1529_s19, %s2013_s19   ;;  %s1482_s18 = sphi %s1527_s18, %s2012_s18   ;;  %s1478_s17 = sphi %s1525_s17, %s2011_s17   ;;  %s1474_s16 = sphi %s1523_s16, %s2010_s16   ;;  %s1470_s15 = sphi %s1521_s15, %s2009_s15  }
   0x5   : > { %s36_s23 = sadd.s32 1, %s1486_s19  ;;  %s159_s24 = sadd.s32 1, %s1478_s17 }
   0x6   : > { %p38_p0 = scmp.ge.s32.totalorder %s36_s23, 2  ;;  %p169_p1 = scmp.ne.s32.totalorder %s1478_s17, %s1474_s16 }
   0x7   : > { %p170_p2 = scmp.eq.s32.totalorder %s1082_s21, 1  ;;  %p175_p3 = scmp.ne.s32.totalorder %s1474_s16, %s1470_s15 }
   0x8   : > { %s2015_s23 = smov (%p38_p0, %s36_s23), 0  ;;  %p176_p5 = scmp.eq.s32.totalorder %s1083_s22, 1 }
   0x9   : > { %p1561_p4 = por %p170_p2, %p169_p1  ;;  %s152_s26 = ssub.s32 %s1486_s19, %s2015_s23 }
   0xa   : > { %p1086_p6 = scmp.ge.s32.totalorder %s1490_s20, 1  ;;  %p157_p7 = scmp.eq.s32.totalorder %s152_s26, 0 }
   0xb   : > { %p1568_p8 = por %p176_p5, %p175_p3  ;;  %p242_p9 = scmp.lt.s32.totalorder %s1490_s20, 3 }
   0xc   : > { %s1574_s28 = scalar_select %p157_p7, %s1478_s17, %s159_s24  }
   0xd   : > { %p243_p10 = pnand %p1086_p6, %p242_p9 }
   0xe   : > { %p297_p11 = scmp.lt.s32.totalorder (!%p243_p10), %s1482_s18, 1  ;;  %v1492_v0 = vmov (!%p243_p10), 0   ;;  %vm398_vm0 = vcmask (!%p243_p10), 261120   ;;  %s293_s24 = sand.u32 (!%p243_p10), 1, %s1474_s16  }
   0xf   : > { %246 = sbr.rel (%p243_p10) target bundleno = 385 (0x181), region = 36  ;;  %1347 = vset.pattern.permute.xlu1 (!%p243_p10), %v1492_v0  ;;  %1346 = vset.pattern.permute.xlu0 (!%p243_p10), %v1492_v0  ;;  %vm1588_vm1 = vmpackc.low (!%p243_p10), %vm398_vm0, %vm398_vm0  ;;  %s1087_s26 = sshll.u32 (!%p243_p10), %s293_s24, 7 }
  0x16   : > { %s1578_s29 = scalar_select %p297_p11, %s1482_s18, 1 }
  0x18   : > { %s1132_s30 = sshll.u32 %s1578_s29, 7  ;;  %s331_s22 = scalar_lea.vmem %s2003_s3, %s1578_s29 }
  0x19   : > { %s1584_s7 = scalar_lea.vmem %s2002_s2, %s1132_s30  ;;  %s1599_s10 = scalar_lea.vmem %s2000_s0, %s1132_s30 }
  0x1a   : > { %v349_v2 = vld [vmem:[%s1584_s7] sm:$0xff]  ;;  %v350_v3 = vld [vmem:[%s1584_s7 + $0x8] sm:$0xff]  ;;  %v351_v4 = vld [vmem:[%s1584_s7 + $0x10] sm:$0xff]  ;;  %s1620_s13 = scalar_lea.vmem %s2001_s1, %s1132_s30  ;;  %s1877_s29 = scalar_lea.vmem [#allocation2], %s1087_s26 }
  0x1b   : > { %v1224_v5 = vpack.c.bf16 %v350_v3, %v349_v2  ;;  %v352_v6 = vld [vmem:[%s1584_s7 + $0x18] sm:$0xff]  ;;  %v333_v8 = vld [vmem:[%s1599_s10] sm:$0xff]  ;;  %v354_v11 = vld [vmem:[%s1584_s7 + $0x28] sm:$0xff]  ;;  %s1135_s30 = sshll.u32 %s1482_s18, 11  ;;  %s951_s5 = sshll.u32 %s1877_s29, 4  ;;  %s1947_s5 = int_to_ptr.vmem [resolvable:$true] %s951_s5 }
  0x1c   : > { %v1230_v7 = vpack.c.bf16 %v352_v6, %v351_v4  ;;  %v341_v9 = vld [vmem:[%s1599_s10 + $0x40] sm:$0xff]  ;;  %v382_v12 = vmul.f32 2.0, %v333_v8  ;;  %v367_v15 = vld [vmem:[%s1620_s13 + $0x10] sm:$0xff]  ;;  %v368_v17 = vld [vmem:[%s1620_s13 + $0x18] sm:$0xff]  ;;  %s1945_s8 = scalar_lea.hbm %s2004_s4, %s1135_s30  ;;  %s1954_s18 = scalar_lea.sflag [#allocation3], %s293_s24 }
  0x1d   : > { %1226 = vmatprep.subr.msk.bf16.mxu0 %vm1588_vm1, %v1224_v5  ;;  %1272 = vmatprep.subr.msk.bf16.mxu1 %vm1588_vm1, %v1224_v5  ;;  %v353_v10 = vld [vmem:[%s1584_s7 + $0x20] sm:$0xff]  ;;  %v390_v13 = vmul.f32 2.0, %v341_v9  ;;  %v355_v18 = vld [vmem:[%s1584_s7 + $0x30] sm:$0xff]  ;;  %v356_v19 = vld [vmem:[%s1584_s7 + $0x38] sm:$0xff]  ;;  %s1412_s9 = scalar_lea.vmem %s1947_s5, 2048 }
  0x1e   : > { %1229 = vmatpush3.bf16.xpose.msk.msra.mxu0 %vm1588_vm1, %v1224_v5  ;;  %1280 = vmatpush3.bf16.xpose.msk.msra.mxu1 %vm1588_vm1, %v1224_v5  ;;  %v1236_v14 = vpack.c.bf16 %v354_v11, %v353_v10  ;;  %v365_v16 = vld [vmem:[%s1620_s13] sm:$0xff]  ;;  %v366_v20 = vld [vmem:[%s1620_s13 + $0x8] sm:$0xff]  ;;  %v1242_v22 = vpack.c.bf16 %v356_v19, %v355_v18  ;;  %v372_v24 = vld [vmem:[%s1620_s13 + $0x38] sm:$0xff]  ;;  %p1413_p12 = scmp.ne.s32.totalorder %s1947_s5, %s1412_s9 }
  0x1f   : > { %1232 = vmatprep.subr.msk.bf16.mxu0 %vm1588_vm1, %v1230_v7  ;;  %1273 = vmatprep.subr.msk.bf16.mxu1 %vm1588_vm1, %v1230_v7  ;;  %v370_v21 = vld [vmem:[%s1620_s13 + $0x28] sm:$0xff]  ;;  %v369_v23 = vld [vmem:[%s1620_s13 + $0x20] sm:$0xff]  ;;  %v371_v27 = vld [vmem:[%s1620_s13 + $0x30] sm:$0xff] }
  0x20   : > { %1200 = vmatprep.mubr.msk.f32.mxu0 %vm398_vm0, %v382_v12  ;;  %1212 = vmatprep.mubr.msk.f32.mxu1 %vm398_vm0, %v390_v13  ;;  %v357_v25 = vld [vmem:[%s1584_s7 + $0x40] sm:$0xff]  ;;  %v358_v26 = vld [vmem:[%s1584_s7 + $0x48] sm:$0xff]  ;;  %v376_v31 = vld [vmem:[%s1620_s13 + $0x58] sm:$0xff]  ;;  %p1414_p13 = pnand %p1413_p12, %p1561_p4 }
  0x21   : > { %652 = vperm.xlu1 %1347, %v367_v15   ;;  %642 = vperm.xlu0 %1346, %v365_v16   ;;  %v374_v28 = vld [vmem:[%s1620_s13 + $0x48] sm:$0xff]  ;;  %v1248_v29 = vpack.c.bf16 %v358_v26, %v357_v25  ;;  %v373_v30 = vld [vmem:[%s1620_s13 + $0x40] sm:$0xff]  ;;  %v359_v32 = vld [vmem:[%s1584_s7 + $0x50] sm:$0xff] }
  0x22   : > { %v360_v33 = vld [vmem:[%s1584_s7 + $0x58] sm:$0xff]  ;;  %v375_v34 = vld [vmem:[%s1620_s13 + $0x50] sm:$0xff]  ;;  %v378_v35 = vld [vmem:[%s1620_s13 + $0x68] sm:$0xff]  ;;  %p1415_p0 = pneg %p1414_p13 }
  0x23   : > { %v1254_v36 = vpack.c.bf16 %v360_v33, %v359_v32  ;;  %v377_v37 = vld [vmem:[%s1620_s13 + $0x60] sm:$0xff]  ;;  %v380_v38 = vld [vmem:[%s1620_s13 + $0x78] sm:$0xff]  ;;  %v362_v40 = vld [vmem:[%s1584_s7 + $0x68] sm:$0xff] }
  0x24   : > { %v361_v39 = vld [vmem:[%s1584_s7 + $0x60] sm:$0xff]  ;;  %v379_v41 = vld [vmem:[%s1620_s13 + $0x70] sm:$0xff]  ;;  %v364_v44 = vld [vmem:[%s1584_s7 + $0x78] sm:$0xff] }
  0x25   : > { %657 = vperm.xlu1 %1347, %v368_v17   ;;  %647 = vperm.xlu0 %1346, %v366_v20   ;;  %v1260_v42 = vpack.c.bf16 %v362_v40, %v361_v39  ;;  %v363_v43 = vld [vmem:[%s1584_s7 + $0x70] sm:$0xff]  ;;  %v334_v46 = vld [vmem:[%s1599_s10 + $0x8] sm:$0xff]  ;;  %v336_v54 = vld [vmem:[%s1599_s10 + $0x18] sm:$0xff] }
  0x26   : > { %1235 = vmatpush3.bf16.xpose.msk.msra.mxu0 %vm1588_vm1, %v1230_v7  ;;  %1281 = vmatpush3.bf16.xpose.msk.msra.mxu1 %vm1588_vm1, %v1230_v7  ;;  %v1266_v45 = vpack.c.bf16 %v364_v44, %v363_v43  ;;  %v342_v47 = vld [vmem:[%s1599_s10 + $0x48] sm:$0xff]  ;;  %v335_v48 = vld [vmem:[%s1599_s10 + $0x10] sm:$0xff]  ;;  %v383_v50 = vmul.f32 2.0, %v334_v46  ;;  %v344_v55 = vld [vmem:[%s1599_s10 + $0x58] sm:$0xff]  ;;  %v385_v58 = vmul.f32 2.0, %v336_v54 }
  0x27   : > { %1238 = vmatprep.subr.msk.bf16.mxu0 %vm1588_vm1, %v1236_v14  ;;  %1274 = vmatprep.subr.msk.bf16.mxu1 %vm1588_vm1, %v1236_v14  ;;  %v343_v49 = vld [vmem:[%s1599_s10 + $0x50] sm:$0xff]  ;;  %v391_v51 = vmul.f32 2.0, %v342_v47  ;;  %v384_v52 = vmul.f32 2.0, %v335_v48  ;;  %v337_v56 = vld [vmem:[%s1599_s10 + $0x20] sm:$0xff]  ;;  %v393_v59 = vmul.f32 2.0, %v344_v55  ;;  %v338_v62 = vld [vmem:[%s1599_s10 + $0x28] sm:$0xff] }
  0x28   : > { %v392_v53 = vmul.f32 2.0, %v343_v49  ;;  %v345_v57 = vld [vmem:[%s1599_s10 + $0x60] sm:$0xff]  ;;  %v386_v60 = vmul.f32 2.0, %v337_v56  ;;  %v346_v63 = vld [vmem:[%s1599_s10 + $0x68] sm:$0xff]  ;;  %v339_v0 = vld [vmem:[%s1599_s10 + $0x30] sm:$0xff]  ;;  %v387_v2 = vmul.f32 2.0, %v338_v62 }
  0x29   : > { %667 = vperm.xlu1 %1347, %v370_v21   ;;  %662 = vperm.xlu0 %1346, %v369_v23   ;;  %v394_v61 = vmul.f32 2.0, %v345_v57  ;;  %v347_v1 = vld [vmem:[%s1599_s10 + $0x70] sm:$0xff]  ;;  %v395_v3 = vmul.f32 2.0, %v346_v63  ;;  %v388_v4 = vmul.f32 2.0, %v339_v0  ;;  %v340_v6 = vld [vmem:[%s1599_s10 + $0x38] sm:$0xff] }
  0x2a   : > { %v396_v5 = vmul.f32 2.0, %v347_v1  ;;  %v348_v7 = vld [vmem:[%s1599_s10 + $0x78] sm:$0xff]  ;;  %v389_v8 = vmul.f32 2.0, %v340_v6  ;;  %s1493_s10 = smov [#allocation2]  }
  0x2b   : > { %v397_v9 = vmul.f32 2.0, %v348_v7  ;;  %s1416_s11 = sshll.u32 %s1493_s10, 4  ;;  %s1417_s11 = int_to_ptr.vmem [resolvable:$false] %s1416_s11 }
  0x2c   : > { %s1418_s12 = scalar_lea.vmem %s1417_s11, 4096  ;;  %p1419_p1 = scmp.lt.s32.totalorder %s1947_s5, %s1417_s11 }
  0x2d   : > { %677 = vperm.xlu1 %1347, %v372_v24   ;;  %672 = vperm.xlu0 %1346, %v371_v27   ;;  %p1420_p2 = scmp.lt.s32.totalorder %s1418_s12, %s1412_s9 }
  0x2e   : > { %1241 = vmatpush3.bf16.xpose.msk.msra.mxu0 %vm1588_vm1, %v1236_v14  ;;  %1282 = vmatpush3.bf16.xpose.msk.msra.mxu1 %vm1588_vm1, %v1236_v14 }
  0x2f   : > { %1244 = vmatprep.subr.msk.bf16.mxu0 %vm1588_vm1, %v1242_v22  ;;  %1275 = vmatprep.subr.msk.bf16.mxu1 %vm1588_vm1, %v1242_v22  ;;  %p1421_p3 = por %p1420_p2, %p1419_p1 }
  0x31   : > { %687 = vperm.xlu1 %1347, %v374_v28   ;;  %682 = vperm.xlu0 %1346, %v373_v30   ;;  %p1422_p5 = pnand %p1421_p3, %p1415_p0 }
  0x35   : > { %697 = vperm.xlu1 %1347, %v376_v31   ;;  %692 = vperm.xlu0 %1346, %v375_v34  }
  0x36   : > { %1247 = vmatpush3.bf16.xpose.msk.msra.mxu0 %vm1588_vm1, %v1242_v22  ;;  %1283 = vmatpush3.bf16.xpose.msk.msra.mxu1 %vm1588_vm1, %v1242_v22  ;;  %v1126_v22 = vld [vmem:[%s331_s22] ss:$0 sm:$0xff] }
  0x37   : > { %1250 = vmatprep.subr.msk.bf16.mxu0 %vm1588_vm1, %v1248_v29  ;;  %1276 = vmatprep.subr.msk.bf16.mxu1 %vm1588_vm1, %v1248_v29 }
  0x39   : > { %707 = vperm.xlu1 %1347, %v378_v35   ;;  %702 = vperm.xlu0 %1346, %v377_v37  }
  0x3d   : > { %717 = vperm.xlu1 %1347, %v380_v38   ;;  %712 = vperm.xlu0 %1346, %v379_v41  }
  0x3e   : > { %1253 = vmatpush3.bf16.xpose.msk.msra.mxu0 %vm1588_vm1, %v1248_v29  ;;  %1284 = vmatpush3.bf16.xpose.msk.msra.mxu1 %vm1588_vm1, %v1248_v29 }
  0x3f   : > { %1256 = vmatprep.subr.msk.bf16.mxu0 %vm1588_vm1, %v1254_v36  ;;  %1277 = vmatprep.subr.msk.bf16.mxu1 %vm1588_vm1, %v1254_v36 }
  0x46   : > { %1259 = vmatpush3.bf16.xpose.msk.msra.mxu0 %vm1588_vm1, %v1254_v36  ;;  %1285 = vmatpush3.bf16.xpose.msk.msra.mxu1 %vm1588_vm1, %v1254_v36 }
  0x47   : > { %1262 = vmatprep.subr.msk.bf16.mxu0 %vm1588_vm1, %v1260_v42  ;;  %1278 = vmatprep.subr.msk.bf16.mxu1 %vm1588_vm1, %v1260_v42 }
  0x4e   : > { %1265 = vmatpush3.bf16.xpose.msk.msra.mxu0 %vm1588_vm1, %v1260_v42  ;;  %1286 = vmatpush3.bf16.xpose.msk.msra.mxu1 %vm1588_vm1, %v1260_v42 }
  0x4f   : > { %1268 = vmatprep.subr.msk.bf16.mxu0 %vm1588_vm1, %v1266_v45  ;;  %1279 = vmatprep.subr.msk.bf16.mxu1 %vm1588_vm1, %v1266_v45 }
  0x56   : > { %1271 = vmatpush3.bf16.xpose.msk.msra.mxu0 %vm1588_vm1, %v1266_v45  ;;  %1287 = vmatpush3.bf16.xpose.msk.msra.mxu1 %vm1588_vm1, %v1266_v45 }
  0x5d   : > { %1201 = vmatmul.mubr.msk.f32.vlgmr.msra.gmra.mrb[0].mxu0 %vm398_vm0, %v383_v50  ;;  %1213 = vmatmul.mubr.msk.f32.vlgmr.msra.gmra.mrb[0].mxu1 %vm398_vm0, %v391_v51 }
  0x5e   : > { %1203 = vmatprep.mubr.msk.f32.mxu0 %vm398_vm0, %v384_v52  ;;  %1215 = vmatprep.mubr.msk.f32.mxu1 %vm398_vm0, %v392_v53 }
  0x61   : > { %1204 = vmatmul.mubr.msk.f32.gmra.mrb[2].mxu0 %vm398_vm0, %v385_v58  ;;  %1216 = vmatmul.mubr.msk.f32.gmra.mrb[2].mxu1 %vm398_vm0, %v393_v59 }
  0x62   : > { %1206 = vmatprep.mubr.msk.f32.mxu0 %vm398_vm0, %v386_v60  ;;  %1218 = vmatprep.mubr.msk.f32.mxu1 %vm398_vm0, %v394_v61 }
  0x65   : > { %1207 = vmatmul.mubr.msk.f32.gmra.mrb[4].mxu0 %vm398_vm0, %v387_v2  ;;  %1219 = vmatmul.mubr.msk.f32.gmra.mrb[4].mxu1 %vm398_vm0, %v395_v3 }
  0x66   : > { %1209 = vmatprep.mubr.msk.f32.mxu0 %vm398_vm0, %v388_v4  ;;  %1221 = vmatprep.mubr.msk.f32.mxu1 %vm398_vm0, %v396_v5 }
  0x69   : > { %1210 = vmatmul.mubr.msk.f32.gmra.mrb[6].mxu0 %vm398_vm0, %v389_v8  ;;  %1222 = vmatmul.mubr.msk.f32.gmra.mrb[6].mxu1 %vm398_vm0, %v397_v9 }
  0xa0   : > { %v653_v10 = vpop.permute.xlu1 %652  ;;  %v643_v11 = vpop.permute.xlu0 %642 }
  0xa1   : > { %v726_v27 = vadd.f32 %v1126_v22, %v643_v11  ;;  %v728_v45 = vadd.f32 %v1126_v22, %v653_v10 }
  0xa4   : > { %v658_v12 = vpop.permute.xlu1 %657  ;;  %v648_v13 = vpop.permute.xlu0 %647 }
  0xa5   : > { %v727_v25 = vadd.f32 %v1126_v22, %v648_v13  ;;  %v729_v46 = vadd.f32 %v1126_v22, %v658_v12 }
  0xa8   : > { %v668_v14 = vpop.permute.xlu1 %667  ;;  %v663_v15 = vpop.permute.xlu0 %662 }
  0xa9   : > { %v731_v47 = vadd.f32 %v1126_v22, %v668_v14  ;;  %v730_v50 = vadd.f32 %v1126_v22, %v663_v15 }
  0xac   : > { %v678_v16 = vpop.permute.xlu1 %677  ;;  %v673_v17 = vpop.permute.xlu0 %672 }
  0xad   : > { %v1743_v51 = vadd.f32 %v1126_v22, %v678_v16  ;;  %v1745_v52 = vadd.f32 %v1126_v22, %v673_v17 }
  0xb0   : > { %v688_v18 = vpop.permute.xlu1 %687  ;;  %v683_v19 = vpop.permute.xlu0 %682 }
  0xb1   : > { %v735_v26 = vadd.f32 %v1126_v22, %v688_v18  ;;  %v734_v28 = vadd.f32 %v1126_v22, %v683_v19 }
  0xb4   : > { %v698_v20 = vpop.permute.xlu1 %697  ;;  %v693_v21 = vpop.permute.xlu0 %692 }
  0xb5   : > { %v737_v53 = vadd.f32 %v1126_v22, %v698_v20  ;;  %v736_v54 = vadd.f32 %v1126_v22, %v693_v21 }
  0xb8   : > { %v708_v23 = vpop.permute.xlu1 %707  ;;  %v703_v24 = vpop.permute.xlu0 %702 }
  0xb9   : > { %v739_v55 = vadd.f32 %v1126_v22, %v708_v23  ;;  %v738_v56 = vadd.f32 %v1126_v22, %v703_v24 }
  0xbc   : > { %v718_v37 = vpop.permute.xlu1 %717  ;;  %v713_v38 = vpop.permute.xlu0 %712 }
  0xbd   : > { %v1749_v57 = vadd.f32 %v1126_v22, %v718_v37  ;;  %v1751_v58 = vadd.f32 %v1126_v22, %v713_v38 }
 0x130   : > { %v1202_v29 = vpop.f32.mrb[0].mxu0  ;;  %v1214_v30 = vpop.f32.mrb[0].mxu1 }
 0x131   : > { %v743_v31 = vsub.f32 %v727_v25, %v1202_v29  ;;  %v751_v32 = vsub.f32 %v735_v26, %v1214_v30  ;;  %v561_v33 = vpop.f32.mrb[1].mxu0  ;;  %v601_v34 = vpop.f32.mrb[1].mxu1 }
 0x132   : > { %v742_v35 = vsub.f32 %v726_v27, %v561_v33  ;;  %v750_v36 = vsub.f32 %v734_v28, %v601_v34 }
 0x133   : > { %v1734_v39 = vmax.f32 %v743_v31, 0.0  ;;  %v1736_v40 = vmax.f32 %v751_v32, 0.0 }
 0x134   : > { %v1738_v41 = vmax.f32 %v742_v35, 0.0  ;;  %v1740_v42 = vmax.f32 %v750_v36, 0.0  ;;  %v1205_v43 = vpop.f32.mrb[2].mxu0  ;;  %v1217_v44 = vpop.f32.mrb[2].mxu1 }
 0x135   : > { %1348 = vrsqrt.f32 %v1734_v39  ;;  %v571_v48 = vpop.f32.mrb[3].mxu0  ;;  %v611_v49 = vpop.f32.mrb[3].mxu1  ;;  %vm783_vm2 = vcmp.eq.f32.partialorder %v1734_v39, inf  ;;  %v745_v61 = vsub.f32 %v729_v46, %v1205_v43  ;;  %v753_v62 = vsub.f32 %v737_v53, %v1217_v44 }
 0x136   : > { %1350 = vrsqrt.f32 %v1736_v40  ;;  %v744_v63 = vsub.f32 %v728_v45, %v571_v48  ;;  %v752_v0 = vsub.f32 %v736_v54, %v611_v49  ;;  %vm785_vm3 = vcmp.eq.f32.partialorder %v1734_v39, 0.0 }
 0x137   : > { %1352 = vrsqrt.f32 %v1738_v41  ;;  %v1756_v7 = vmax.f32 %v745_v61, 0.0  ;;  %v1758_v8 = vmax.f32 %v753_v62, 0.0  ;;  %v786_v10 = vand.u32 2147483648, %v1734_v39 }
 0x138   : > { %1354 = vrsqrt.f32 %v1740_v42  ;;  %v1208_v59 = vpop.f32.mrb[4].mxu0  ;;  %v1220_v60 = vpop.f32.mrb[4].mxu1  ;;  %v1760_v9 = vmax.f32 %v744_v63, 0.0  ;;  %vm839_vm4 = vcmp.eq.f32.partialorder %v1736_v40, inf  ;;  %vm841_vm5 = vcmp.eq.f32.partialorder %v1736_v40, 0.0 }
 0x139   : > { %v581_v1 = vpop.f32.mrb[5].mxu0  ;;  %v621_v2 = vpop.f32.mrb[5].mxu1  ;;  %v747_v3 = vsub.f32 %v731_v47, %v1208_v59  ;;  %v755_v4 = vsub.f32 %v739_v55, %v1220_v60  ;;  %v1765_v11 = vmax.f32 %v752_v0, 0.0  ;;  %v842_v14 = vand.u32 2147483648, %v1736_v40 }
 0x13a   : > { %v746_v5 = vsub.f32 %v730_v50, %v581_v1  ;;  %v754_v6 = vsub.f32 %v738_v56, %v621_v2  ;;  %vm776_vm6 = vcmp.eq.f32.partialorder %v1738_v41, inf  ;;  %1356 = vrsqrt.f32 %v1756_v7 }
 0x13b   : > { %v1774_v15 = vmax.f32 %v747_v3, 0.0  ;;  %vm778_vm7 = vcmp.eq.f32.partialorder %v1738_v41, 0.0  ;;  %v779_v18 = vand.u32 2147483648, %v1738_v41  ;;  %vm832_vm8 = vcmp.eq.f32.partialorder %v1740_v42, inf }
 0x13c   : > { %v1767_v12 = vpop.f32.mrb[6].mxu0  ;;  %v1769_v13 = vpop.f32.mrb[6].mxu1  ;;  %1358 = vrsqrt.f32 %v1758_v8  ;;  %vm834_vm9 = vcmp.eq.f32.partialorder %v1740_v42, 0.0  ;;  %v835_v20 = vand.u32 2147483648, %v1740_v42  ;;  %v1787_v21 = vmax.f32 %v755_v4, 0.0 }
 0x13d   : > { %v1776_v16 = vpop.f32.mrb[7].mxu0  ;;  %v1778_v17 = vpop.f32.mrb[7].mxu1  ;;  %1360 = vrsqrt.f32 %v1760_v9  ;;  %v1791_v24 = vmax.f32 %v746_v5, 0.0  ;;  %v1793_v25 = vmax.f32 %v754_v6, 0.0  ;;  %vm797_vm10 = vcmp.eq.f32.partialorder %v1756_v7, inf }
 0x13e   : > { %1362 = vrsqrt.f32 %v1765_v11  ;;  %v800_v28 = vand.u32 2147483648, %v1756_v7  ;;  %vm799_vm11 = vcmp.eq.f32.partialorder %v1756_v7, 0.0  ;;  %vm853_vm12 = vcmp.eq.f32.partialorder %v1758_v8, inf }
 0x13f   : > { %v1349_v19 = vpop.eup %1348  ;;  %1364 = vrsqrt.f32 %v1774_v15  ;;  %v856_v32 = vand.u32 2147483648, %v1758_v8  ;;  %vm855_vm13 = vcmp.eq.f32.partialorder %v1758_v8, 0.0  ;;  %vm790_vm14 = vcmp.eq.f32.partialorder %v1760_v9, inf }
 0x140   : > { %v1351_v22 = vpop.eup %1350  ;;  %v782_v23 = vmul.f32 %v1349_v19, %v1734_v39  ;;  %1366 = vrsqrt.f32 %v1787_v21  ;;  %vm792_vm15 = vcmp.eq.f32.partialorder %v1760_v9, 0.0  ;;  %v793_v46 = vand.u32 2147483648, %v1760_v9 }
 0x141   : > { %v1353_v26 = vpop.eup %1352  ;;  %v838_v27 = vmul.f32 %v1351_v22, %v1736_v40  ;;  %vm846_vm0 = vcmp.eq.f32.partialorder %v1765_v11, inf  ;;  %vm848_vm1 = vcmp.eq.f32.partialorder %v1765_v11, 0.0  ;;  %v849_v50 = vand.u32 2147483648, %v1765_v11 }
 0x142   : > { %v1355_v29 = vpop.eup %1354  ;;  %v784_v30 = vsel %vm783_vm2, %v1734_v39, %v782_v23  ;;  %v775_v31 = vmul.f32 %v1353_v26, %v1738_v41  ;;  %vm811_vm2 = vcmp.eq.f32.partialorder %v1774_v15, inf  ;;  %v814_v54 = vand.u32 2147483648, %v1774_v15 }
 0x143   : > { %v787_v33 = vsel %vm785_vm3, %v786_v10, %v784_v30  ;;  %v840_v34 = vsel %vm839_vm4, %v1736_v40, %v838_v27  ;;  %v831_v35 = vmul.f32 %v1355_v29, %v1740_v42  ;;  %vm813_vm3 = vcmp.eq.f32.partialorder %v1774_v15, 0.0 }
 0x144   : > { %v887_v36 = vadd.f32 2.0, %v787_v33  ;;  %v843_v37 = vsel %vm841_vm5, %v842_v14, %v840_v34  ;;  %v777_v38 = vsel %vm776_vm6, %v1738_v41, %v775_v31  ;;  %v1357_v47 = vpop.eup %1356  ;;  %v749_v60 = vsub.f32 %v1743_v51, %v1767_v12 }
 0x145   : > { %v895_v39 = vadd.f32 2.0, %v843_v37  ;;  %v780_v43 = vsel %vm778_vm7, %v779_v18, %v777_v38  ;;  %v833_v44 = vsel %vm832_vm8, %v1740_v42, %v831_v35  ;;  %v796_v49 = vmul.f32 %v1357_v47, %v1756_v7 }
 0x146   : > { %1368 = vrcp.f32 %v887_v36  ;;  %v886_v40 = vadd.f32 2.0, %v780_v43  ;;  %v836_v45 = vsel %vm834_vm9, %v835_v20, %v833_v44  ;;  %v1359_v41 = vpop.eup %1358  ;;  %v1865_v10 = vmax.f32 %v749_v60, 0.0 }
 0x147   : > { %1370 = vrcp.f32 %v895_v39  ;;  %v894_v48 = vadd.f32 2.0, %v836_v45  ;;  %v1361_v42 = vpop.eup %1360  ;;  %v852_v53 = vmul.f32 %v1359_v41, %v1758_v8  ;;  %v798_v56 = vsel %vm797_vm10, %v1756_v7, %v796_v49 }
 0x148   : > { %1372 = vrcp.f32 %v886_v40  ;;  %v1363_v55 = vpop.eup %1362  ;;  %v789_v59 = vmul.f32 %v1361_v42, %v1760_v9  ;;  %v801_v62 = vsel %vm799_vm11, %v800_v28, %v798_v56  ;;  %vm867_vm4 = vcmp.eq.f32.partialorder %v1787_v21, inf }
 0x149   : > { %1374 = vrcp.f32 %v894_v48  ;;  %v1365_v61 = vpop.eup %1364  ;;  %v854_v63 = vsel %vm853_vm12, %v1758_v8, %v852_v53  ;;  %v845_v0 = vmul.f32 %v1363_v55, %v1765_v11  ;;  %v889_v1 = vadd.f32 2.0, %v801_v62 }
 0x14a   : > { %1376 = vrsqrt.f32 %v1791_v24  ;;  %v857_v2 = vsel %vm855_vm13, %v856_v32, %v854_v63  ;;  %v791_v51 = vsel %vm790_vm14, %v1760_v9, %v789_v59  ;;  %v810_v3 = vmul.f32 %v1365_v61, %v1774_v15  ;;  %v1367_v4 = vpop.eup %1366 }
 0x14b   : > { %1378 = vrsqrt.f32 %v1793_v25  ;;  %v897_v5 = vadd.f32 2.0, %v857_v2  ;;  %v794_v6 = vsel %vm792_vm15, %v793_v46, %v791_v51  ;;  %v847_v7 = vsel %vm846_vm0, %v1765_v11, %v845_v0 }
 0x14c   : > { %1380 = vrcp.f32 %v889_v1  ;;  %v888_v8 = vadd.f32 2.0, %v794_v6  ;;  %v850_v12 = vsel %vm848_vm1, %v849_v50, %v847_v7  ;;  %v812_v14 = vsel %vm811_vm2, %v1774_v15, %v810_v3 }
 0x14d   : > { %1382 = vrcp.f32 %v897_v5  ;;  %v896_v18 = vadd.f32 2.0, %v850_v12  ;;  %v815_v9 = vsel %vm813_vm3, %v814_v54, %v812_v14  ;;  %v866_v19 = vmul.f32 %v1367_v4, %v1787_v21 }
 0x14e   : > { %1384 = vrcp.f32 %v888_v8  ;;  %v891_v22 = vadd.f32 2.0, %v815_v9  ;;  %v870_v23 = vand.u32 2147483648, %v1787_v21  ;;  %vm869_vm5 = vcmp.eq.f32.partialorder %v1787_v21, 0.0 }
 0x14f   : > { %1386 = vrcp.f32 %v896_v18  ;;  %v868_v15 = vsel %vm867_vm4, %v1787_v21, %v866_v19  ;;  %v757_v26 = vsub.f32 %v1749_v57, %v1769_v13  ;;  %v748_v29 = vsub.f32 %v1745_v52, %v1776_v16 }
 0x150   : > { %v1369_v20 = vpop.eup %1368  ;;  %1388 = vrcp.f32 %v891_v22  ;;  %v871_v28 = vsel %vm869_vm5, %v870_v23, %v868_v15  ;;  %v756_v30 = vsub.f32 %v1751_v58, %v1778_v17  ;;  %vm804_vm6 = vcmp.eq.f32.partialorder %v1791_v24, inf }
 0x151   : > { %v1371_v11 = vpop.eup %1370  ;;  %919 = vst [vmem:[%s1877_s29 + $0x8] sm:$0xff] %v1369_v20  ;;  %v899_v32 = vadd.f32 2.0, %v871_v28  ;;  %1390 = vrsqrt.f32 %v1865_v10  ;;  %v1891_v33 = vmax.f32 %v757_v26, 0.0  ;;  %v1894_v57 = vmax.f32 %v748_v29, 0.0 }
 0x152   : > { %v1373_v27 = vpop.eup %1372  ;;  %927 = vst [vmem:[%s1877_s29 + $0x48] sm:$0xff] %v1371_v11  ;;  %v1896_v13 = vmax.f32 %v756_v30, 0.0  ;;  %vm806_vm7 = vcmp.eq.f32.partialorder %v1791_v24, 0.0  ;;  %v807_v58 = vand.u32 2147483648, %v1791_v24  ;;  %vm860_vm8 = vcmp.eq.f32.partialorder %v1793_v25, inf }
 0x153   : > { %v1375_v31 = vpop.eup %1374  ;;  %918 = vst [vmem:[%s1877_s29] sm:$0xff] %v1373_v27  ;;  %1392 = vrcp.f32 %v899_v32  ;;  %v863_v35 = vand.u32 2147483648, %v1793_v25  ;;  %vm862_vm9 = vcmp.eq.f32.partialorder %v1793_v25, 0.0  ;;  %vm825_vm10 = vcmp.eq.f32.partialorder %v1865_v10, inf }
 0x154   : > { %v1377_v21 = vpop.eup %1376  ;;  %926 = vst [vmem:[%s1877_s29 + $0x40] sm:$0xff] %v1375_v31  ;;  %1394 = vrsqrt.f32 %v1891_v33  ;;  %v828_v41 = vand.u32 2147483648, %v1865_v10  ;;  %vm827_vm11 = vcmp.eq.f32.partialorder %v1865_v10, 0.0  ;;  %vm881_vm12 = vcmp.eq.f32.partialorder %v1891_v33, inf }
 0x155   : > { %v1379_v34 = vpop.eup %1378  ;;  %v803_v52 = vmul.f32 %v1377_v21, %v1791_v24  ;;  %1396 = vrsqrt.f32 %v1894_v57  ;;  %vm883_vm13 = vcmp.eq.f32.partialorder %v1891_v33, 0.0  ;;  %v884_v55 = vand.u32 2147483648, %v1891_v33 }
 0x156   : > { %v859_v16 = vmul.f32 %v1379_v34, %v1793_v25  ;;  %v1381_v36 = vpop.eup %1380  ;;  %1398 = vrsqrt.f32 %v1896_v13  ;;  %vm818_vm14 = vcmp.eq.f32.partialorder %v1894_v57, inf  ;;  %vm820_vm15 = vcmp.eq.f32.partialorder %v1894_v57, 0.0 }
 0x157   : > { %v805_v17 = vsel %vm804_vm6, %v1791_v24, %v803_v52  ;;  %v1383_v39 = vpop.eup %1382  ;;  %921 = vst [vmem:[%s1877_s29 + $0x18] sm:$0xff] %v1381_v36  ;;  %v821_v62 = vand.u32 2147483648, %v1894_v57  ;;  %vm874_vm0 = vcmp.eq.f32.partialorder %v1896_v13, inf  ;;  %v877_v2 = vand.u32 2147483648, %v1896_v13 }
 0x158   : > { %v808_v37 = vsel %vm806_vm7, %v807_v58, %v805_v17  ;;  %v861_v38 = vsel %vm860_vm8, %v1793_v25, %v859_v16  ;;  %v1385_v44 = vpop.eup %1384  ;;  %929 = vst [vmem:[%s1877_s29 + $0x58] sm:$0xff] %v1383_v39  ;;  %vm876_vm1 = vcmp.eq.f32.partialorder %v1896_v13, 0.0 }
 0x159   : > { %v890_v24 = vadd.f32 2.0, %v808_v37  ;;  %v864_v43 = vsel %vm862_vm9, %v863_v35, %v861_v38  ;;  %v1387_v45 = vpop.eup %1386  ;;  %920 = vst [vmem:[%s1877_s29 + $0x10] sm:$0xff] %v1385_v44 }
 0x15a   : > { %v898_v40 = vadd.f32 2.0, %v864_v43  ;;  %v1389_v46 = vpop.eup %1388  ;;  %928 = vst [vmem:[%s1877_s29 + $0x50] sm:$0xff] %v1387_v45 }
 0x15b   : > { %1400 = vrcp.f32 %v890_v24  ;;  %v1391_v47 = vpop.eup %1390  ;;  %923 = vst [vmem:[%s1877_s29 + $0x28] sm:$0xff] %v1389_v46 }
 0x15c   : > { %1402 = vrcp.f32 %v898_v40  ;;  %v824_v25 = vmul.f32 %v1391_v47, %v1865_v10 }
 0x15d   : > { %v1393_v48 = vpop.eup %1392 }
 0x15e   : > { %v1395_v49 = vpop.eup %1394  ;;  %931 = vst [vmem:[%s1877_s29 + $0x68] sm:$0xff] %v1393_v48  ;;  %v826_v50 = vsel %vm825_vm10, %v1865_v10, %v824_v25 }
 0x15f   : > { %v1397_v42 = vpop.eup %1396  ;;  %v829_v53 = vsel %vm827_vm11, %v828_v41, %v826_v50  ;;  %v880_v54 = vmul.f32 %v1395_v49, %v1891_v33 }
 0x160   : > { %v1399_v56 = vpop.eup %1398  ;;  %v893_v59 = vadd.f32 2.0, %v829_v53  ;;  %v817_v60 = vmul.f32 %v1397_v42, %v1894_v57 }
 0x161   : > { %v882_v61 = vsel %vm881_vm12, %v1891_v33, %v880_v54  ;;  %v873_v63 = vmul.f32 %v1399_v56, %v1896_v13 }
 0x162   : > { %1404 = vrcp.f32 %v893_v59  ;;  %v885_v0 = vsel %vm883_vm13, %v884_v55, %v882_v61  ;;  %v819_v1 = vsel %vm818_vm14, %v1894_v57, %v817_v60 }
 0x163   : > { %v901_v3 = vadd.f32 2.0, %v885_v0  ;;  %v822_v4 = vsel %vm820_vm15, %v821_v62, %v819_v1  ;;  %v875_v5 = vsel %vm874_vm0, %v1896_v13, %v873_v63 }
 0x164   : > { %v892_v7 = vadd.f32 2.0, %v822_v4  ;;  %v878_v10 = vsel %vm876_vm1, %v877_v2, %v875_v5 }
 0x165   : > { %v1401_v51 = vpop.eup %1400  ;;  %1406 = vrcp.f32 %v901_v3  ;;  %v900_v8 = vadd.f32 2.0, %v878_v10 }
 0x166   : > { %v1403_v6 = vpop.eup %1402  ;;  %922 = vst [vmem:[%s1877_s29 + $0x20] sm:$0xff] %v1401_v51  ;;  %1408 = vrcp.f32 %v892_v7 }
 0x167   : > { %930 = vst [vmem:[%s1877_s29 + $0x60] sm:$0xff] %v1403_v6  ;;  %1410 = vrcp.f32 %v900_v8 }
 0x16c   : > { %v1405_v12 = vpop.eup %1404 }
 0x16d   : > { %925 = vst [vmem:[%s1877_s29 + $0x38] sm:$0xff] %v1405_v12 }
 0x16f   : > { %v1407_v14 = vpop.eup %1406 }
 0x170   : > { %v1409_v18 = vpop.eup %1408  ;;  %933 = vst [vmem:[%s1877_s29 + $0x78] sm:$0xff] %v1407_v14 }
 0x171   : > { %v1411_v9 = vpop.eup %1410  ;;  %924 = vst [vmem:[%s1877_s29 + $0x30] sm:$0xff] %v1409_v18 }
 0x172   : > { %932 = vst [vmem:[%s1877_s29 + $0x70] sm:$0xff] %v1411_v9 }
 0x173   : > { %1425 = shalt.err (!%p1422_p5)
}
 0x174   : > { %s1426_s13 = scalar_lea.hbm %s1945_s8, 2048  ;;  %s1430_s22 = scalar_lea.hbm %s2004_s4, 4096 }
 0x175   : > { %p1427_p6 = scmp.ne.s32.totalorder %s1945_s8, %s1426_s13  ;;  %p1431_p10 = scmp.lt.u32.totalorder %s1945_s8, %s2004_s4 }
 0x176   : > { %p1432_p11 = scmp.lt.u32.totalorder %s1430_s22, %s1426_s13  ;;  %p1434_p13 = scmp.lt.u32.totalorder %s1426_s13, %s1945_s8 }
 0x177   : > { %p1428_p7 = pnand %p1427_p6, %p1561_p4 }
 0x178   : > { %p1433_p12 = por %p1432_p11, %p1431_p10 }
 0x179   : > { %p1429_p9 = pneg %p1428_p7 }
 0x17a   : > { %p1435_p0 = por %p1434_p13, %p1433_p12 }
 0x17c   : > { %p1436_p1 = pnand %p1435_p0, %p1429_p9 }
 0x17e   : > { %1439 = shalt.err (!%p1436_p1)
}
 0x17f   : > { %s1494_s29 = smov 128   ;;  %s1495_s30 = smov 8  }
 0x180   : > { %1288 = dma.vmem_to_hbm [thread:$0]  (%p1561_p4), %s1947_s5, 2048, %s1945_s8, %s1954_s18, %s1494_s29, %s1494_s29, %s1495_s30  }
 0x181 PF: > { %p1294_p2 = scmp.ge.s32.totalorder %s1490_s20, 2  ;;  %s966_s6 = sand.u32 1, %s1470_s15  }
 0x182   : > { %s967_s7 = scalar_lea.sflag [#allocation3], %s966_s6 }
 0x183   : > { %p1291_p3 = pnand %p1294_p2, %p1568_p8 }
 0x185   : > { %1465 = dma.done.wait (!%p1291_p3), %s967_s7, 2048  }
 0x186   : > { %1467 = vsyncadd (!%p1291_p3), %s967_s7, 4294965248  ;;  %s17_s20 = sadd.s32 1, %s1490_s20   ;;  %s2009_s15 = smov %s1474_s16 }
 0x187   : > { %p14_p5 = scmp.ge.s32.totalorder %s17_s20, 4   ;;  %s2010_s16 = smov %s1478_s17 }
 0x188   : > { %s2011_s17 = smov %s1574_s28  ;;  %s2012_s18 = smov %s1486_s19 }
 0x189   : > { %s2013_s19 = smov %s2015_s23  ;;  %16 = sbr.rel (!%p14_p5) target bundleno = 4 (0x4), region = 80 }
 0x190   :  { %972 = vsyncpa [#allocation3], 1 }
 0x191   :  { %974 = vsyncpa [#allocation3 + $0x1], 1 }

</bundles_post_ra>
